<compile_context>
chip_gen: v7x
topology: tpu7x:2x2x1
jax: 0.10.0
libtpu: 0.0.40
codegen_flags: <defaults>
</compile_context>

<pallas_src>
import functools
import math

import jax
import jax.numpy as jnp
from jax.experimental import pallas as pl
from jax.experimental.pallas import tpu as pltpu


def _round_up(x, m):
    return ((x + m - 1) // m) * m


# ----------------------------- Pallas kernel -----------------------------

def _embed_ln_kernel(x_ref, w_ref, b_ref, g_ref, beta_ref, o_ref, *, eps):
    """One M-tile: o = LayerNorm(x @ w + b) * gamma + beta (LN over last axis)."""
    # bf16 operands -> MXU, f32 accumulation.
    y = jnp.dot(x_ref[...], w_ref[...], preferred_element_type=jnp.float32)
    y = y + b_ref[...]
    # LayerNorm over the embedding dim, entirely in f32 (two-pass mean/var).
    mu = jnp.mean(y, axis=-1, keepdims=True)
    yc = y - mu
    var = jnp.mean(yc * yc, axis=-1, keepdims=True)
    inv = jax.lax.rsqrt(var + eps)
    o_ref[...] = (yc * inv * g_ref[...] + beta_ref[...]).astype(o_ref.dtype)


def fused_embed_layernorm(x, w, b, g, beta, *, eps=1e-5, tm_cap=512,
                          out_dtype=jnp.float32):
    """y = LayerNorm(x @ w + b; gamma=g, beta=beta).

    x: (M, K) bf16 patch matrix, w: (K, N) bf16, b/g/beta: (1, N) f32 -> (M, N).

    * K is NOT padded: block extent == array extent waives the 128-lane rule.
    * N stays whole inside each block (the LN reduction spans it); N=128 in the
      demo so stores are lane-dense.
    * M is tiled with a "parallel" grid axis; tm is a 16-multiple, capped at 512,
      and picked so the grid has >= 2 steps (v7x megacore / pipelining).
    """
    M, K = x.shape
    N = w.shape[1]

    tm = min(tm_cap, _round_up(max((M + 1) // 2, 16), 16))
    Mp = _round_up(M, tm)
    if Mp != M:
        # Cheap (< tm bf16 rows); fused by XLA into the patch-gather producer.
        x = jnp.pad(x, ((0, Mp - M), (0, 0)))

    out = pl.pallas_call(
        functools.partial(_embed_ln_kernel, eps=eps),
        grid=(Mp // tm,),
        in_specs=[
            # Activation tile: streams over M, default double-buffering.
            pl.BlockSpec((tm, K), lambda i: (i, 0)),
            # Grid-invariant operands: resident, single-buffered.
            pl.BlockSpec((K, N), lambda i: (0, 0), pipeline_mode=pl.Buffered(1)),
            pl.BlockSpec((1, N), lambda i: (0, 0), pipeline_mode=pl.Buffered(1)),
            pl.BlockSpec((1, N), lambda i: (0, 0), pipeline_mode=pl.Buffered(1)),
            pl.BlockSpec((1, N), lambda i: (0, 0), pipeline_mode=pl.Buffered(1)),
        ],
        out_specs=pl.BlockSpec((tm, N), lambda i: (i, 0)),
        out_shape=jax.ShapeDtypeStruct((Mp, N), out_dtype),
        compiler_params=pltpu.CompilerParams(
            dimension_semantics=("parallel",),
            # Well under v7x's 64 MiB/TC; per-step footprint is a few MiB even at
            # CvT stage-3 shapes (tm=512, K=1728, N=384).
            vmem_limit_bytes=32 * 1024 * 1024,
        ),
    )(x, w, b, g, beta)
    return out[:M]


# ----------------------------- plain-JAX glue -----------------------------

def extract_patches_bf16(x, p, s):
    """NCHW f32 -> (B*OH*OW, C*p*p) bf16 im2col matrix, patch elements flattened in
    (c, kh, kw) order (matches nn.Conv2d weight layout).  One vectorized XLA
    gather + transpose with the bf16 cast fused in -- no separate pad/cast copy."""
    B, C, H, W = x.shape
    OH = (H - p) // s + 1
    OW = (W - p) // s + 1
    ri = (jnp.arange(OH) * s)[:, None] + jnp.arange(p)[None, :]   # (OH, p)
    ci = (jnp.arange(OW) * s)[:, None] + jnp.arange(p)[None, :]   # (OW, p)
    g = x[:, :, ri, :]                               # (B, C, OH, p, W)
    g = g[:, :, :, :, ci]                            # (B, C, OH, p, OW, p)
    g = jnp.transpose(g, (0, 2, 4, 1, 3, 5))         # (B, OH, OW, C, p, p)
    g = g.astype(jnp.bfloat16)                       # cast fused into the same producer
    return g.reshape(B * OH * OW, C * p * p), OH, OW


def cvt_embedding_forward(x, params, *, patch_size, stride, eps=1e-5,
                          out_dtype=jnp.float32):
    """CVTEmbedding.forward: Conv2d patch embed -> 'b c h w -> b (h w) c' -> LayerNorm."""
    B = x.shape[0]
    patches, OH, OW = extract_patches_bf16(x, patch_size, stride)
    y = fused_embed_layernorm(
        patches, params["w2d"], params["conv_b"], params["ln_g"], params["ln_b"],
        eps=eps, out_dtype=out_dtype)
    return y.reshape(B, OH * OW, -1)


# ----------------------------- params & reference -----------------------------

def init_params(key, in_ch, embed_dim, patch_size):
    kw, kb = jax.random.split(key)
    fan_in = in_ch * patch_size * patch_size
    bound = 1.0 / math.sqrt(fan_in)                  # PyTorch Conv2d default init range
    conv_w = jax.random.uniform(kw, (embed_dim, in_ch, patch_size, patch_size),
                                jnp.float32, minval=-bound, maxval=bound)
    conv_b = jax.random.uniform(kb, (embed_dim,), jnp.float32,
                                minval=-bound, maxval=bound)
    return dict(
        conv_w=conv_w,                                                # f32, reference only
        # Kernel-ready operands, prepared ONCE at init (not per forward under jit):
        w2d=conv_w.reshape(embed_dim, fan_in).T.astype(jnp.bfloat16),  # (C*p*p, D) bf16
        conv_b=conv_b.reshape(1, embed_dim),                           # (1, D) f32
        ln_g=jnp.ones((1, embed_dim), jnp.float32),
        ln_b=jnp.zeros((1, embed_dim), jnp.float32),
    )


def reference_forward(x, params, *, patch_size, stride, eps=1e-5):
    """Pure-JAX f32 reference (lax conv + rearrange + LayerNorm)."""
    y = jax.lax.conv_general_dilated(
        x, params["conv_w"], window_strides=(stride, stride), padding="VALID",
        dimension_numbers=("NCHW", "OIHW", "NCHW"))
    y = y + params["conv_b"].reshape(-1)[None, :, None, None]
    B, D, OH, OW = y.shape
    y = jnp.transpose(y, (0, 2, 3, 1)).reshape(B, OH * OW, D)   # b c h w -> b (h w) c
    mu = jnp.mean(y, axis=-1, keepdims=True)
    var = jnp.mean((y - mu) ** 2, axis=-1, keepdims=True)
    return ((y - mu) / jnp.sqrt(var + eps) * params["ln_g"].reshape(-1)
            + params["ln_b"].reshape(-1))


# ----------------------------- main -----------------------------

if __name__ == "__main__":
    key = jax.random.PRNGKey(0)
    pkey, xkey = jax.random.split(key)

    B, C, H, W = 2, 4, 16, 16
    embed_dim, patch_size, stride = 128, 3, 2     # N=128 -> lane-dense output stores

    params = init_params(pkey, C, embed_dim, patch_size)
    x = jax.random.normal(xkey, (B, C, H, W), dtype=jnp.float32)

    fwd = jax.jit(functools.partial(cvt_embedding_forward,
                                    patch_size=patch_size, stride=stride))
    out = jax.block_until_ready(fwd(x, params))

    OH = (H - patch_size) // stride + 1
    OW = (W - patch_size) // stride + 1
    assert out.shape == (B, OH * OW, embed_dim), out.shape
    assert bool(jnp.all(jnp.isfinite(out)))

    # Relative tolerance vs f32 reference (bf16 matmul/weight operands, K=36).
    ref = reference_forward(x, params, patch_size=patch_size, stride=stride)
    denom = float(jnp.maximum(jnp.max(jnp.abs(ref)), 1.0))
    rel_err = float(jnp.max(jnp.abs(out - ref))) / denom
    assert rel_err < 2e-2, f"relative error vs reference too large: {rel_err}"

    print("KERNEL_OK")
</pallas_src>

<mosaic_0001>
module attributes {stable_mosaic.version = 11 : i64} {
  func.func @_embed_ln_kernel(%arg0: i32, %arg1: memref<64x36xbf16, #tpu.memory_space<vmem>>, %arg2: memref<36x128xbf16, #tpu.memory_space<vmem>>, %arg3: memref<1x128xf32, #tpu.memory_space<vmem>>, %arg4: memref<1x128xf32, #tpu.memory_space<vmem>>, %arg5: memref<1x128xf32, #tpu.memory_space<vmem>>, %arg6: memref<64x128xf32, #tpu.memory_space<vmem>>) attributes {dimension_semantics = [#tpu.dimension_semantics<parallel>], iteration_bounds = array<i64: 2>, scalar_prefetch = 0 : i64, scratch_operands = 0 : i64, tpu.core_type = #tpu.core_type<tc>, window_params = [{transform_indices = @transform_0, window_bounds = array<i64: 64, 36>}, {pipeline_mode = #tpu.pipeline_mode<synchronous>, transform_indices = @transform_1, window_bounds = array<i64: 36, 128>}, {pipeline_mode = #tpu.pipeline_mode<synchronous>, transform_indices = @transform_2, window_bounds = array<i64: 1, 128>}, {pipeline_mode = #tpu.pipeline_mode<synchronous>, transform_indices = @transform_3, window_bounds = array<i64: 1, 128>}, {pipeline_mode = #tpu.pipeline_mode<synchronous>, transform_indices = @transform_4, window_bounds = array<i64: 1, 128>}, {transform_indices = @transform_5, window_bounds = array<i64: 64, 128>}]} {
    %c0 = arith.constant 0 : index
    %c0_0 = arith.constant 0 : index
    %0 = vector.load %arg1[%c0, %c0_0] : memref<64x36xbf16, #tpu.memory_space<vmem>>, vector<64x36xbf16>
    %c0_1 = arith.constant 0 : index
    %c0_2 = arith.constant 0 : index
    %1 = vector.load %arg2[%c0_1, %c0_2] : memref<36x128xbf16, #tpu.memory_space<vmem>>, vector<36x128xbf16>
    %cst = arith.constant dense<0.000000e+00> : vector<64x128xf32>
    %2 = tpu.matmul %0, %1, %cst {dimension_numbers = #tpu.dot_dimension_numbers<[1], [0], [0], [1], [0, 0, 1, 1], [], []>} : vector<64x36xbf16>, vector<36x128xbf16>, vector<64x128xf32> -> vector<64x128xf32>
    %c0_3 = arith.constant 0 : index
    %c0_4 = arith.constant 0 : index
    %3 = vector.load %arg3[%c0_3, %c0_4] : memref<1x128xf32, #tpu.memory_space<vmem>>, vector<1x128xf32>
    %4 = vector.broadcast %3 : vector<1x128xf32> to vector<64x128xf32>
    %5 = arith.addf %2, %4 : vector<64x128xf32>
    %cst_5 = arith.constant dense<0.000000e+00> : vector<64xf32>
    %6 = vector.multi_reduction <add>, %5, %cst_5 [1] : vector<64x128xf32> to vector<64xf32>
    %7 = vector.shape_cast %6 : vector<64xf32> to vector<64x1xf32>
    %cst_6 = arith.constant 1.280000e+02 : f32
    %8 = vector.broadcast %cst_6 : f32 to vector<64x1xf32>
    %9 = arith.divf %7, %8 : vector<64x1xf32>
    %10 = vector.broadcast %9 : vector<64x1xf32> to vector<64x128xf32>
    %11 = arith.subf %5, %10 : vector<64x128xf32>
    %12 = arith.mulf %11, %11 : vector<64x128xf32>
    %cst_7 = arith.constant dense<0.000000e+00> : vector<64xf32>
    %13 = vector.multi_reduction <add>, %12, %cst_7 [1] : vector<64x128xf32> to vector<64xf32>
    %14 = vector.shape_cast %13 : vector<64xf32> to vector<64x1xf32>
    %cst_8 = arith.constant 1.280000e+02 : f32
    %15 = vector.broadcast %cst_8 : f32 to vector<64x1xf32>
    %16 = arith.divf %14, %15 : vector<64x1xf32>
    %cst_9 = arith.constant 9.99999974E-6 : f32
    %17 = vector.broadcast %cst_9 : f32 to vector<64x1xf32>
    %18 = arith.addf %16, %17 : vector<64x1xf32>
    %19 = math.rsqrt %18 : vector<64x1xf32>
    %20 = vector.broadcast %19 : vector<64x1xf32> to vector<64x128xf32>
    %21 = arith.mulf %11, %20 : vector<64x128xf32>
    %c0_10 = arith.constant 0 : index
    %c0_11 = arith.constant 0 : index
    %22 = vector.load %arg4[%c0_10, %c0_11] : memref<1x128xf32, #tpu.memory_space<vmem>>, vector<1x128xf32>
    %23 = vector.broadcast %22 : vector<1x128xf32> to vector<64x128xf32>
    %24 = arith.mulf %21, %23 : vector<64x128xf32>
    %c0_12 = arith.constant 0 : index
    %c0_13 = arith.constant 0 : index
    %25 = vector.load %arg5[%c0_12, %c0_13] : memref<1x128xf32, #tpu.memory_space<vmem>>, vector<1x128xf32>
    %26 = vector.broadcast %25 : vector<1x128xf32> to vector<64x128xf32>
    %27 = arith.addf %24, %26 : vector<64x128xf32>
    %c0_14 = arith.constant 0 : index
    %c0_15 = arith.constant 0 : index
    %28 = vector.load %arg6[%c0_14, %c0_15] : memref<64x128xf32, #tpu.memory_space<vmem>>, vector<64x128xf32>
    tpu.vector_store %arg6[%c0_14, %c0_15], %27 {strides = array<i32>} : memref<64x128xf32, #tpu.memory_space<vmem>>, vector<64x128xf32>,
    return
  }
  func.func @transform_0(%arg0: i32) -> (i32, i32) {
    %c0_i32 = arith.constant 0 : i32
    %c0_i32_0 = arith.constant 0 : i32
    return %arg0, %c0_i32 : i32, i32
  }
  func.func @transform_1(%arg0: i32) -> (i32, i32) {
    %c0_i32 = arith.constant 0 : i32
    %c0_i32_0 = arith.constant 0 : i32
    %c0_i32_1 = arith.constant 0 : i32
    return %c0_i32, %c0_i32_0 : i32, i32
  }
  func.func @transform_2(%arg0: i32) -> (i32, i32) {
    %c0_i32 = arith.constant 0 : i32
    %c0_i32_0 = arith.constant 0 : i32
    %c0_i32_1 = arith.constant 0 : i32
    return %c0_i32, %c0_i32_0 : i32, i32
  }
  func.func @transform_3(%arg0: i32) -> (i32, i32) {
    %c0_i32 = arith.constant 0 : i32
    %c0_i32_0 = arith.constant 0 : i32
    %c0_i32_1 = arith.constant 0 : i32
    return %c0_i32, %c0_i32_0 : i32, i32
  }
  func.func @transform_4(%arg0: i32) -> (i32, i32) {
    %c0_i32 = arith.constant 0 : i32
    %c0_i32_0 = arith.constant 0 : i32
    %c0_i32_1 = arith.constant 0 : i32
    return %c0_i32, %c0_i32_0 : i32, i32
  }
  func.func @transform_5(%arg0: i32) -> (i32, i32) {
    %c0_i32 = arith.constant 0 : i32
    %c0_i32_0 = arith.constant 0 : i32
    return %arg0, %c0_i32 : i32, i32
  }
}

</mosaic_0001>

<bundles_post_ra>
// kernel: cvt_embedding_forward.1
= control target key start
LH: loop header
LB: loop body
LE: loop exit
PB: predicated region body
PF: predicated region fallthrough
CT: control target
= control target key end

     0   :  { %s672_s18 = smov 0   ;;  %s761_s0 = inlined_call_operand.vmem [shape: bf16[128,36], index: 0, kind: input, shape index: {}]   ;;  %s762_s1 = inlined_call_operand.vmem [shape: bf16[36,128], index: 1, kind: input, shape index: {}]   ;;  %s763_s2 = inlined_call_operand.vmem [shape: f32[1,128], index: 2, kind: input, shape index: {}]   ;;  %s764_s3 = inlined_call_operand.vmem [shape: f32[1,128], index: 3, kind: input, shape index: {}]   ;;  %s765_s4 = inlined_call_operand.vmem [shape: f32[1,128], index: 4, kind: input, shape index: {}]   ;;  %s766_s5 = inlined_call_operand.vmem [shape: f32[128,128], index: 5, kind: output, shape index: {}]  }
   0x1 LB: > { %s549_s19 = sadd.s32 4294967295, %s640_s18   ;;  %p553_p0 = scmp.ge.s32.totalorder %s640_s18, 1  ;;  %s640_s18 = sphi %s672_s18, %s15_s18  }
   0x2   : > { %p188_p1 = scmp.lt.s32.totalorder %s640_s18, 3 }
   0x4   : > { %p189_p2 = pnand %p553_p0, %p188_p1 }
   0x5   : > { %v611_v0 = vld [vmem:[%s762_s1] sm:$0xff] (!%p189_p2)   ;;  %v612_v1 = vld [vmem:[%s762_s1 + $0x8] sm:$0xff] (!%p189_p2)   ;;  %s554_s24 = sshll.u32 (!%p189_p2), %s549_s19, 3  ;;  %v613_v2 = vld [vmem:[%s762_s1 + $0x10] ss:$0 sps:$4 sm:$0x33] (!%p189_p2)  }
   0x6   : > { %192 = sbr.rel (%p189_p2) target bundleno = 561 (0x231), region = 40  ;;  %581 = vmatprep.subr.bf16.mxu0 (!%p189_p2), %v611_v0  ;;  %595 = vmatprep.subr.bf16.mxu1 (!%p189_p2), %v611_v0  ;;  %p217_p3 = scmp.lt.s32.totalorder (!%p189_p2), %s554_s24, 15  ;;  %vm297_vm0 = vcmask (!%p189_p2), 1041408   ;;  %vm284_vm1 = vcmask (!%p189_p2), 293888   ;;  %v558_v8 = vld [vmem:[%s763_s2] ss:$0 sm:$0xff] (!%p189_p2) }
   0x7   : > { %582 = vmatpush3.bf16.msra.mxu0 (!%p189_p2), %v611_v0  ;;  %598 = vmatpush3.bf16.msra.mxu1 (!%p189_p2), %v611_v0  ;;  %v299_v3 = vsel (!%p189_p2), %vm297_vm0, %v613_v2, 0 }
   0x8   : > { %583 = vmatprep.subr.bf16.mxu0 (!%p189_p2), %v612_v1  ;;  %596 = vmatprep.subr.bf16.mxu1 (!%p189_p2), %v612_v1 }
   0xb   : > { %584 = vmatpush3.bf16.msra.mxu0 (!%p189_p2), %v612_v1  ;;  %599 = vmatpush3.bf16.msra.mxu1 (!%p189_p2), %v612_v1 }
   0xc   : > { %601 = vmatprep.subr.msk.bf16.mxu0 (!%p189_p2), %vm297_vm0, %v613_v2  ;;  %602 = vmatprep.subr.msk.bf16.mxu1 (!%p189_p2), %vm297_vm0, %v613_v2 }
   0xd   : > { %s768_s24 = smov (!%p217_p3, %s554_s24), 15 }
   0xe   : > { %s555_s27 = sshll.u32 %s768_s24, 2  ;;  %s557_s10 = sshll.u32 %s768_s24, 3 }
   0xf   : > { %s220_s30 = scalar_lea.vmem %s761_s0, %s555_s27  ;;  %586 = vmatpush3.bf16.msra.mxu0 %v299_v3  ;;  %600 = vmatpush3.bf16.msra.mxu1 %v299_v3  ;;  %s741_s15 = scalar_lea.vmem %s766_s5, %s557_s10 }
  0x10   : > { %v614_v4 = vld [vmem:[%s220_s30] sm:$0xff]   ;;  %v615_v5 = vld [vmem:[%s220_s30 + $0x8] sm:$0xff]   ;;  %v616_v6 = vld [vmem:[%s220_s30 + $0x10] sm:$0xff]  }
  0x11   : > { %587 = vmatprep.mubr.msk.bf16.mxu0 %vm284_vm1, %v614_v4  ;;  %v617_v7 = vld [vmem:[%s220_s30 + $0x18] sm:$0xff]   ;;  %591 = vmatprep.mubr.msk.bf16.mxu1 %vm284_vm1, %v616_v6 }
  0x12   : > { %588 = vmatmul.mubr.msk.bf16.vlgmr.msra.gmra.mrb[0].mxu0 %vm284_vm1, %v615_v5  ;;  %592 = vmatmul.mubr.msk.bf16.vlgmr.msra.gmra.mrb[0].mxu1 %vm284_vm1, %v617_v7 }
  0xe5   : > { %v589_v9 = vpop.f32.mrb[0].mxu0  ;;  %v593_v10 = vpop.f32.mrb[0].mxu1 }
  0xe6   : > { %v344_v11 = vadd.f32 %v589_v9, %v558_v8  ;;  %v335_v12 = vpop.f32.mrb[1].mxu0  ;;  %v351_v13 = vpop.f32.mrb[1].mxu1  ;;  %v360_v24 = vadd.f32 %v593_v10, %v558_v8 }
  0xe7   : > { %v336_v14 = vadd.f32 %v558_v8, %v335_v12  ;;  %v590_v15 = vpop.f32.mrb[2].mxu0  ;;  %v594_v16 = vpop.f32.mrb[2].mxu1  ;;  %v352_v19 = vadd.f32 %v558_v8, %v351_v13  ;;  %v570_v13 = vld [vmem:[%s764_s3] ss:$0 sm:$0xff] }
  0xe8   : > { %370 = vadd.xlane.f32.xlu1 %v344_v11  ;;  %v338_v17 = vpop.f32.mrb[3].mxu0  ;;  %v354_v18 = vpop.f32.mrb[3].mxu1  ;;  %v347_v20 = vadd.f32 %v590_v15, %v558_v8  ;;  %v363_v23 = vadd.f32 %v594_v16, %v558_v8 }
  0xe9   : > { %366 = vadd.xlane.f32.xlu0 %v336_v14  ;;  %v355_v21 = vadd.f32 %v558_v8, %v354_v18  ;;  %v339_v22 = vadd.f32 %v558_v8, %v338_v17  ;;  %v571_v17 = vld [vmem:[%s765_s4] ss:$0 sm:$0xff] }
  0xec   : > { %372 = vadd.xlane.f32.xlu1 %v347_v20 }
  0xed   : > { %374 = vadd.xlane.f32.xlu0 %v352_v19 }
  0xf0   : > { %376 = vadd.xlane.f32.xlu1 %v355_v21 }
  0xf1   : > { %368 = vadd.xlane.f32.xlu0 %v339_v22 }
  0xf4   : > { %380 = vadd.xlane.f32.xlu1 %v363_v23 }
  0xf5   : > { %378 = vadd.xlane.f32.xlu0 %v360_v24 }
 0x175   : > { %v371_v25 = vpop.xlane.xlu1 %370 }
 0x176   : > { %v385_v26 = vmul.f32 0.0078125, %v371_v25  ;;  %v367_v27 = vpop.xlane.xlu0 %366 }
 0x177   : > { %v383_v28 = vmul.f32 0.0078125, %v367_v27 }
 0x178   : > { %v698_v29 = vsub.f32 %v344_v11, %v385_v26 }
 0x179   : > { %v373_v30 = vpop.xlane.xlu1 %372  ;;  %v700_v31 = vsub.f32 %v336_v14, %v383_v28 }
 0x17a   : > { %v386_v32 = vmul.f32 0.0078125, %v373_v30  ;;  %v375_v33 = vpop.xlane.xlu0 %374  ;;  %v401_v34 = vmul.f32 %v698_v29, %v698_v29 }
 0x17b   : > { %v387_v35 = vmul.f32 0.0078125, %v375_v33  ;;  %v399_v41 = vmul.f32 %v700_v31, %v700_v31 }
 0x17c   : > { %v704_v36 = vsub.f32 %v347_v20, %v386_v32  ;;  %411 = vadd.xlane.f32.xlu0 %v401_v34 }
 0x17d   : > { %v377_v37 = vpop.xlane.xlu1 %376  ;;  %v706_v38 = vsub.f32 %v352_v19, %v387_v35 }
 0x17e   : > { %v369_v39 = vpop.xlane.xlu0 %368  ;;  %v402_v40 = vmul.f32 %v704_v36, %v704_v36  ;;  %v388_v42 = vmul.f32 0.0078125, %v377_v37 }
 0x17f   : > { %v384_v43 = vmul.f32 0.0078125, %v369_v39  ;;  %v403_v47 = vmul.f32 %v706_v38, %v706_v38 }
 0x180   : > { %413 = vadd.xlane.f32.xlu1 %v402_v40  ;;  %407 = vadd.xlane.f32.xlu0 %v399_v41  ;;  %v716_v48 = vsub.f32 %v355_v21, %v388_v42 }
 0x181   : > { %v712_v44 = vsub.f32 %v339_v22, %v384_v43  ;;  %v381_v45 = vpop.xlane.xlu1 %380 }
 0x182   : > { %v379_v46 = vpop.xlane.xlu0 %378  ;;  %v390_v49 = vmul.f32 0.0078125, %v381_v45  ;;  %v404_v54 = vmul.f32 %v716_v48, %v716_v48 }
 0x183   : > { %v389_v50 = vmul.f32 0.0078125, %v379_v46  ;;  %v400_v51 = vmul.f32 %v712_v44, %v712_v44 }
 0x184   : > { %415 = vadd.xlane.f32.xlu0 %v403_v47  ;;  %v722_v53 = vsub.f32 %v363_v23, %v390_v49 }
 0x185   : > { %v720_v52 = vsub.f32 %v360_v24, %v389_v50  ;;  %409 = vadd.xlane.f32.xlu1 %v400_v51 }
 0x186   : > { %v406_v56 = vmul.f32 %v722_v53, %v722_v53 }
 0x187   : > { %v405_v55 = vmul.f32 %v720_v52, %v720_v52 }
 0x189   : > { %417 = vadd.xlane.f32.xlu1 %v404_v54  ;;  %419 = vadd.xlane.f32.xlu0 %v405_v55 }
 0x18d   : > { %421 = vadd.xlane.f32.xlu1 %v406_v56 }
 0x209   : > { %v412_v57 = vpop.xlane.xlu0 %411 }
 0x20a   : > { %v425_v58 = vmul.f32 0.0078125, %v412_v57 }
 0x20c   : > { %v433_v59 = vadd.f32 1e-05, %v425_v58 }
 0x20d   : > { %v414_v60 = vpop.xlane.xlu1 %413  ;;  %v408_v61 = vpop.xlane.xlu0 %407 }
 0x20e   : > { %618 = vrsqrt.f32 %v433_v59  ;;  %v426_v62 = vmul.f32 0.0078125, %v414_v60  ;;  %v423_v63 = vmul.f32 0.0078125, %v408_v61 }
 0x210   : > { %v434_v0 = vadd.f32 1e-05, %v426_v62  ;;  %v431_v1 = vadd.f32 1e-05, %v423_v63 }
 0x211   : > { %v416_v2 = vpop.xlane.xlu0 %415 }
 0x212   : > { %620 = vrsqrt.f32 %v434_v0  ;;  %v427_v3 = vmul.f32 0.0078125, %v416_v2  ;;  %v410_v4 = vpop.xlane.xlu1 %409 }
 0x213   : > { %622 = vrsqrt.f32 %v431_v1  ;;  %v424_v5 = vmul.f32 0.0078125, %v410_v4 }
 0x214   : > { %v435_v6 = vadd.f32 1e-05, %v427_v3 }
 0x215   : > { %v432_v7 = vadd.f32 1e-05, %v424_v5 }
 0x216   : > { %624 = vrsqrt.f32 %v435_v6  ;;  %v418_v8 = vpop.xlane.xlu1 %417  ;;  %v420_v9 = vpop.xlane.xlu0 %419 }
 0x217   : > { %626 = vrsqrt.f32 %v432_v7  ;;  %v428_v10 = vmul.f32 0.0078125, %v418_v8  ;;  %v429_v11 = vmul.f32 0.0078125, %v420_v9 }
 0x218   : > { %v619_v12 = vpop.eup %618 }
 0x219   : > { %v449_v14 = vmul.f32 %v619_v12, %v698_v29  ;;  %v436_v15 = vadd.f32 1e-05, %v428_v10  ;;  %v437_v16 = vadd.f32 1e-05, %v429_v11 }
 0x21a   : > { %v422_v18 = vpop.xlane.xlu1 %421 }
 0x21b   : > { %v464_v19 = vmul.f32 %v570_v13, %v449_v14  ;;  %628 = vrsqrt.f32 %v436_v15  ;;  %v430_v20 = vmul.f32 0.0078125, %v422_v18 }
 0x21c   : > { %v621_v21 = vpop.eup %620  ;;  %630 = vrsqrt.f32 %v437_v16 }
 0x21d   : > { %v623_v22 = vpop.eup %622  ;;  %v479_v23 = vadd.f32 %v571_v17, %v464_v19  ;;  %v450_v24 = vmul.f32 %v621_v21, %v704_v36  ;;  %v438_v25 = vadd.f32 1e-05, %v430_v20 }
 0x21e   : > { %v447_v26 = vmul.f32 %v623_v22, %v700_v31 }
 0x21f   : > { %487 = vst [vmem:[%s741_s15 + $0x10] sm:$0xff] %v479_v23  ;;  %v465_v27 = vmul.f32 %v570_v13, %v450_v24  ;;  %632 = vrsqrt.f32 %v438_v25 }
 0x220   : > { %v625_v28 = vpop.eup %624  ;;  %v462_v29 = vmul.f32 %v570_v13, %v447_v26 }
 0x221   : > { %v627_v30 = vpop.eup %626  ;;  %v480_v32 = vadd.f32 %v571_v17, %v465_v27  ;;  %v451_v33 = vmul.f32 %v625_v28, %v706_v38 }
 0x222   : > { %v477_v34 = vadd.f32 %v571_v17, %v462_v29  ;;  %v448_v35 = vmul.f32 %v627_v30, %v712_v44 }
 0x223   : > { %488 = vst [vmem:[%s741_s15 + $0x18] sm:$0xff] %v480_v32  ;;  %v466_v37 = vmul.f32 %v570_v13, %v451_v33 }
 0x224   : > { %485 = vst [vmem:[%s741_s15] sm:$0xff] %v477_v34  ;;  %v463_v36 = vmul.f32 %v570_v13, %v448_v35 }
 0x225   : > { %v629_v31 = vpop.eup %628  ;;  %v481_v39 = vadd.f32 %v571_v17, %v466_v37 }
 0x226   : > { %v631_v40 = vpop.eup %630  ;;  %v478_v41 = vadd.f32 %v571_v17, %v463_v36  ;;  %v452_v42 = vmul.f32 %v629_v31, %v716_v48 }
 0x227   : > { %489 = vst [vmem:[%s741_s15 + $0x20] sm:$0xff] %v481_v39  ;;  %v453_v43 = vmul.f32 %v631_v40, %v720_v52 }
 0x228   : > { %486 = vst [vmem:[%s741_s15 + $0x8] sm:$0xff] %v478_v41  ;;  %v467_v38 = vmul.f32 %v570_v13, %v452_v42 }
 0x229   : > { %v633_v45 = vpop.eup %632  ;;  %v468_v44 = vmul.f32 %v570_v13, %v453_v43 }
 0x22a   : > { %v482_v46 = vadd.f32 %v571_v17, %v467_v38  ;;  %v454_v47 = vmul.f32 %v633_v45, %v722_v53 }
 0x22b   : > { %v483_v49 = vadd.f32 %v571_v17, %v468_v44 }
 0x22c   : > { %490 = vst [vmem:[%s741_s15 + $0x28] sm:$0xff] %v482_v46  ;;  %v469_v50 = vmul.f32 %v570_v13, %v454_v47 }
 0x22d   : > { %491 = vst [vmem:[%s741_s15 + $0x30] sm:$0xff] %v483_v49 }
 0x22e   : > { %v484_v51 = vadd.f32 %v571_v17, %v469_v50 }
 0x230   : > { %492 = vst [vmem:[%s741_s15 + $0x38] sm:$0xff] %v484_v51 }
 0x231 PF: > { %s15_s18 = sadd.s32 1, %s640_s18  }
 0x232   : > { %p12_p4 = scmp.ge.s32.totalorder %s15_s18, 4  }
 0x234   :  { %14 = sbr.rel (!%p12_p4) target bundleno = 1 (0x1), region = 70 }

</bundles_post_ra>
